<compile_context>
chip_gen: v7x
topology: tpu7x:2x2x1
jax: 0.10.0
libtpu: 0.0.40
codegen_flags: <defaults>
</compile_context>

<pallas_src>
import functools

import jax
import jax.numpy as jnp
from jax.experimental import pallas as pl
from jax.experimental.pallas import tpu as pltpu

# Exact constants used by the PyTorch module (not math.pi).
PI4 = 4 * 3.1415926
PI2 = 2 * 3.1415926


def _encode_points_kernel(x_ref, y_ref, labels_ref, cmat_ref, table_ref,
                          out_ref, *, half_dim):
    """Fused point/box prompt encoding.

    x_ref, y_ref: (B, N)   f32 normalized coords in [0, 1]
    labels_ref:   (B, N)   i32 point labels in [0, 5)
    cmat_ref:     (2, D/2) f32 coord projection matrix
    table_ref:    (5, D)   f32 point-embedding table
    out_ref:      (B, N, D) f32
    """
    tx = x_ref[...] * PI4 - PI2                         # (B, N)
    ty = y_ref[...] * PI4 - PI2                         # (B, N)
    row0 = cmat_ref[0:1, :][None]                       # (1, 1, D/2)
    row1 = cmat_ref[1:2, :][None]                       # (1, 1, D/2)
    # Broadcast-FMA projection on the VPU (contraction dim is only 2).
    rad = tx[..., None] * row0 + ty[..., None] * row1   # (B, N, D/2)

    labels = labels_ref[...][..., None]                 # (B, N, 1) int32
    valid = labels != 4                                 # (B, N, 1) bool

    # 5-row embedding table -> unrolled select-accumulate (no clean TPU gather).
    # TODO(synk): labels outside [0, 5) are not supported (matches nn.Embedding
    # contract only when callers guarantee labels in [0, 5)).
    pe_lo = jnp.zeros_like(rad)
    pe_hi = jnp.zeros_like(rad)
    for k in range(5):
        sel = labels == k
        pe_lo = pe_lo + jnp.where(sel, table_ref[k:k + 1, :half_dim][None], 0.0)
        pe_hi = pe_hi + jnp.where(sel, table_ref[k:k + 1, half_dim:][None], 0.0)

    # Store the sin / cos halves directly (no in-kernel concat).
    out_ref[:, :, :half_dim] = jnp.where(valid, jnp.sin(rad), 0.0) + pe_lo
    out_ref[:, :, half_dim:] = jnp.where(valid, jnp.cos(rad), 0.0) + pe_hi


def _grid_pos_kernel(cmat_ref, out_ref, *, gh, gw, block_rows, half_dim):
    """Grid positional embedding; coords are generated in-kernel from iota.

    cmat_ref: (2, D/2)        f32 coord projection matrix
    out_ref:  (block_rows, D) f32, one row tile of the (gh*gw, D) output.
    """
    i = pl.program_id(0)
    local = jax.lax.broadcasted_iota(jnp.int32, (block_rows, half_dim), 0)
    flat = local + i * block_rows                       # global flat row index
    r = flat // gw                                      # grid row
    c = flat - r * gw                                   # grid col
    x = (c.astype(jnp.float32) + 0.5) / gw
    y = (r.astype(jnp.float32) + 0.5) / gh
    tx = x * PI4 - PI2
    ty = y * PI4 - PI2
    rad = tx * cmat_ref[0:1, :] + ty * cmat_ref[1:2, :]  # (block_rows, D/2)
    out_ref[:, :half_dim] = jnp.sin(rad)
    out_ref[:, half_dim:] = jnp.cos(rad)


class PromptEncoder:
    """JAX/Pallas port of tokenize_anything PromptEncoder."""

    def __init__(self, embed_dim, image_size, key):
        k1, k2 = jax.random.split(key)
        self.embed_dim = int(embed_dim)
        self.img_size = [int(image_size)] * 2
        # nn.Embedding(5, embed_dim).weight  ~ N(0, 1)
        self.point_embed = jax.random.normal(k1, (5, self.embed_dim), jnp.float32)
        # registered buffer coord_matrix ~ N(0, 1)
        self.coord_matrix = jax.random.normal(k2, (2, self.embed_dim // 2), jnp.float32)
        self.corner_labels = jnp.array([[2, 3]], dtype=jnp.int32)
        self.img_pos = None
        self._img_pos_key = None

    # ---------------- glue (plain JAX) ----------------

    def to_points(self, points=None, boxes=None):
        divisor = jnp.asarray(self.img_size[::-1], dtype=jnp.float32)  # (w, h)
        if points is not None:
            if isinstance(points, (tuple, list)):
                coords, labels = points
            else:
                coords, labels = points[:, :, :2], points[:, :, 2]
            coords = jnp.clip((coords + 0.5) / divisor, 0.0, 1.0).astype(jnp.float32)
            labels = labels.astype(jnp.int32)
            return coords, labels
        if boxes is not None:
            coords = boxes.reshape((-1, 2, 2))
            coords = jnp.clip((coords + 0.5) / divisor, 0.0, 1.0).astype(jnp.float32)
            labels = jnp.broadcast_to(self.corner_labels, (coords.shape[0], 2))
            return coords, labels.astype(jnp.int32)
        return None

    # ---------------- Pallas-backed compute ----------------

    def encode_points(self, coords, labels):
        """coords: (B, N, 2) normalized; labels: (B, N) int32 -> (B, N, D)."""
        B, N, _ = coords.shape
        D = self.embed_dim
        Dh = D // 2
        x = coords[..., 0]                              # (B, N)
        y = coords[..., 1]                              # (B, N)
        labels = labels.astype(jnp.int32)
        kernel = functools.partial(_encode_points_kernel, half_dim=Dh)
        cost = pl.CostEstimate(
            flops=10 * B * N * D,
            transcendentals=B * N * D,
            bytes_accessed=4 * (3 * B * N + 2 * Dh + 5 * D + B * N * D),
        )
        return pl.pallas_call(
            kernel,
            out_shape=jax.ShapeDtypeStruct((B, N, D), jnp.float32),
            in_specs=[pl.BlockSpec(memory_space=pltpu.MemorySpace.VMEM)] * 5,
            out_specs=pl.BlockSpec(memory_space=pltpu.MemorySpace.VMEM),
            cost_estimate=cost,
        )(x, y, labels, self.coord_matrix, self.point_embed)

    def encode_grid(self, grid_size):
        """grid_size: (gh, gw) -> (gh*gw, D) positional embedding."""
        gh, gw = int(grid_size[0]), int(grid_size[1])
        M = gh * gw
        D = self.embed_dim
        Dh = D // 2
        # Row-tiled parallel grid: lane-dense (rows, D) output blocks; block
        # rows large enough to reach the HBM-store roofline but small enough
        # for v7x's 32 MiB scoped-VMEM default with double buffering.
        block_rows = M if M <= 512 else 512
        grid = (pl.cdiv(M, block_rows),)
        kernel = functools.partial(
            _grid_pos_kernel, gh=gh, gw=gw, block_rows=block_rows, half_dim=Dh)
        return pl.pallas_call(
            kernel,
            out_shape=jax.ShapeDtypeStruct((M, D), jnp.float32),
            grid=grid,
            in_specs=[pl.BlockSpec((2, Dh), lambda i: (0, 0))],
            out_specs=pl.BlockSpec((block_rows, D), lambda i: (i, 0)),
            compiler_params=pltpu.CompilerParams(
                dimension_semantics=("parallel",)),
        )(self.coord_matrix)

    # ---------------- forward ----------------

    def forward(self, inputs):
        sparse_embeds = []
        coords_list, labels_list = [], []
        if inputs.get('boxes', None) is not None:
            c, l = self.to_points(boxes=inputs['boxes'])
            coords_list.append(c)
            labels_list.append(l)
        if inputs.get('points', None) is not None:
            c, l = self.to_points(points=inputs['points'])
            coords_list.append(c)
            labels_list.append(l)
        if coords_list:
            # Fuse boxes + points into a single pallas_call (boxes first, same
            # order as concatenating the two separate encodes).
            if len(coords_list) > 1:
                coords = jnp.concatenate(coords_list, axis=1)
                labels = jnp.concatenate(labels_list, axis=1)
            else:
                coords, labels = coords_list[0], labels_list[0]
            sparse_embeds.append(self.encode_points(coords, labels))
        if inputs.get('protos', None) is not None:
            sparse_embeds.append(inputs['protos'])
        if len(sparse_embeds) > 1:
            sparse_embeds = [jnp.concatenate(sparse_embeds, axis=1)]
        elif len(sparse_embeds) == 0:
            raise ValueError('Excepted ``points`` or ``boxes`` prompts.')

        img_embed_size = inputs['img_embeds'].shape[2:-1]
        grid_key = tuple(int(s) for s in img_embed_size)
        if self.img_pos is None or self._img_pos_key != grid_key:
            self.img_pos = self.encode_grid(grid_key)   # already (H*W, D)
            self._img_pos_key = grid_key
        return {'sparse_embeds': sparse_embeds[0], 'img_pos': self.img_pos}


if __name__ == "__main__":
    embed_dim, image_size = 32, 16
    enc = PromptEncoder(embed_dim, image_size, jax.random.PRNGKey(0))

    k1, k2, k3 = jax.random.split(jax.random.PRNGKey(0), 3)
    # boxes: (B, 4) in pixel coords
    boxes = jax.random.uniform(k1, (2, 4), jnp.float32) * image_size
    # points: (B, N, 3) = (x, y, label); label 4 is the "invalid" label
    pts_xy = jax.random.uniform(k2, (2, 3, 2), jnp.float32) * image_size
    pts_lb = jnp.array([[1.0, 2.0, 4.0], [0.0, 1.0, 4.0]], jnp.float32)[..., None]
    points = jnp.concatenate([pts_xy, pts_lb], axis=-1)
    # img_embeds: (B, 1, H, W, D) -> grid size = (H, W) = (4, 4)
    img_embeds = jax.random.normal(k3, (2, 1, 4, 4, embed_dim), jnp.float32)

    out = enc.forward({'boxes': boxes, 'points': points, 'img_embeds': img_embeds})
    sparse = jax.block_until_ready(out['sparse_embeds'])
    img_pos = jax.block_until_ready(out['img_pos'])

    assert sparse.shape == (2, 5, embed_dim)
    assert img_pos.shape == (16, embed_dim)

    # ---- pure-JAX reference check (matches the PyTorch math) ----
    def ref_encode_coords(coords, cmat):
        rad = (coords * PI4 - PI2) @ cmat
        return jnp.concatenate([jnp.sin(rad), jnp.cos(rad)], axis=-1)

    cb, lb = enc.to_points(boxes=boxes)
    cp, lp = enc.to_points(points=points)
    rcoords = jnp.concatenate([cb, cp], axis=1)
    rlabels = jnp.concatenate([lb, lp], axis=1)
    remb = ref_encode_coords(rcoords, enc.coord_matrix)
    remb = (remb * (rlabels != 4).astype(jnp.float32)[..., None]
            + enc.point_embed[rlabels])
    assert jnp.allclose(sparse, remb, atol=1e-4, rtol=1e-4)

    gy = (jnp.arange(4, dtype=jnp.float32) + 0.5) / 4
    gx = (jnp.arange(4, dtype=jnp.float32) + 0.5) / 4
    xx, yy = jnp.meshgrid(gx, gy)
    gcoords = jnp.stack([xx, yy], axis=-1).reshape(-1, 2)
    ref_pos = ref_encode_coords(gcoords, enc.coord_matrix)
    assert jnp.allclose(img_pos, ref_pos, atol=1e-4, rtol=1e-4)

    print("KERNEL_OK")
</pallas_src>

<mosaic_0001>
module attributes {stable_mosaic.version = 11 : i64} {
  func.func @_encode_points_kernel(%arg0: memref<2x5xf32, #tpu.memory_space<vmem>>, %arg1: memref<2x5xf32, #tpu.memory_space<vmem>>, %arg2: memref<2x5xi32, #tpu.memory_space<vmem>>, %arg3: memref<2x16xf32, #tpu.memory_space<vmem>>, %arg4: memref<5x32xf32, #tpu.memory_space<vmem>>, %arg5: memref<2x5x32xf32, #tpu.memory_space<vmem>>) attributes {dimension_semantics = [], scalar_prefetch = 0 : i64, scratch_operands = 0 : i64, tpu.core_type = #tpu.core_type<tc>} {
    %c0 = arith.constant 0 : index
    %c0_0 = arith.constant 0 : index
    %0 = vector.load %arg0[%c0, %c0_0] : memref<2x5xf32, #tpu.memory_space<vmem>>, vector<2x5xf32>
    %cst = arith.constant 12.56637 : f32
    %1 = vector.broadcast %cst : f32 to vector<2x5xf32>
    %2 = arith.mulf %0, %1 : vector<2x5xf32>
    %cst_1 = arith.constant 6.283185 : f32
    %3 = vector.broadcast %cst_1 : f32 to vector<2x5xf32>
    %4 = arith.subf %2, %3 : vector<2x5xf32>
    %c0_2 = arith.constant 0 : index
    %c0_3 = arith.constant 0 : index
    %5 = vector.load %arg1[%c0_2, %c0_3] : memref<2x5xf32, #tpu.memory_space<vmem>>, vector<2x5xf32>
    %cst_4 = arith.constant 12.56637 : f32
    %6 = vector.broadcast %cst_4 : f32 to vector<2x5xf32>
    %7 = arith.mulf %5, %6 : vector<2x5xf32>
    %cst_5 = arith.constant 6.283185 : f32
    %8 = vector.broadcast %cst_5 : f32 to vector<2x5xf32>
    %9 = arith.subf %7, %8 : vector<2x5xf32>
    %c0_6 = arith.constant 0 : index
    %c0_7 = arith.constant 0 : index
    %10 = vector.load %arg3[%c0_6, %c0_7] : memref<2x16xf32, #tpu.memory_space<vmem>>, vector<1x16xf32>
    %11 = vector.shape_cast %10 : vector<1x16xf32> to vector<1x1x16xf32>
    %c1 = arith.constant 1 : index
    %c0_8 = arith.constant 0 : index
    %12 = vector.load %arg3[%c1, %c0_8] : memref<2x16xf32, #tpu.memory_space<vmem>>, vector<1x16xf32>
    %13 = vector.shape_cast %12 : vector<1x16xf32> to vector<1x1x16xf32>
    %14 = vector.shape_cast %4 : vector<2x5xf32> to vector<2x5x1xf32>
    %15 = vector.broadcast %14 : vector<2x5x1xf32> to vector<2x5x16xf32>
    %16 = vector.broadcast %11 : vector<1x1x16xf32> to vector<2x5x16xf32>
    %17 = arith.mulf %15, %16 : vector<2x5x16xf32>
    %18 = vector.shape_cast %9 : vector<2x5xf32> to vector<2x5x1xf32>
    %19 = vector.broadcast %18 : vector<2x5x1xf32> to vector<2x5x16xf32>
    %20 = vector.broadcast %13 : vector<1x1x16xf32> to vector<2x5x16xf32>
    %21 = arith.mulf %19, %20 : vector<2x5x16xf32>
    %22 = arith.addf %17, %21 : vector<2x5x16xf32>
    %c0_9 = arith.constant 0 : index
    %c0_10 = arith.constant 0 : index
    %23 = vector.load %arg2[%c0_9, %c0_10] : memref<2x5xi32, #tpu.memory_space<vmem>>, vector<2x5xi32>
    %24 = vector.shape_cast %23 : vector<2x5xi32> to vector<2x5x1xi32>
    %c4_i32 = arith.constant 4 : i32
    %25 = vector.broadcast %c4_i32 : i32 to vector<2x5x1xi32>
    %26 = arith.cmpi ne, %24, %25 : vector<2x5x1xi32>
    %cst_11 = arith.constant 0.000000e+00 : f32
    %27 = vector.broadcast %cst_11 : f32 to vector<2x5x16xf32>
    %cst_12 = arith.constant 0.000000e+00 : f32
    %28 = vector.broadcast %cst_12 : f32 to vector<2x5x16xf32>
    %c0_i32 = arith.constant 0 : i32
    %29 = vector.broadcast %c0_i32 : i32 to vector<2x5x1xi32>
    %30 = arith.cmpi eq, %24, %29 : vector<2x5x1xi32>
    %c0_13 = arith.constant 0 : index
    %c0_14 = arith.constant 0 : index
    %31 = vector.load %arg4[%c0_13, %c0_14] : memref<5x32xf32, #tpu.memory_space<vmem>>, vector<1x16xf32>
    %32 = vector.shape_cast %31 : vector<1x16xf32> to vector<1x1x16xf32>
    %cst_15 = arith.constant 0.000000e+00 : f32
    %33 = vector.shape_cast %30 : vector<2x5x1xi1> to vector<2x5x1xi1>
    %34 = vector.broadcast %33 : vector<2x5x1xi1> to vector<2x5x16xi1>
    %35 = vector.shape_cast %32 : vector<1x1x16xf32> to vector<1x1x16xf32>
    %36 = vector.broadcast %35 : vector<1x1x16xf32> to vector<2x5x16xf32>
    %37 = vector.broadcast %cst_15 : f32 to vector<2x5x16xf32>
    %38 = arith.select %34, %36, %37 : vector<2x5x16xi1>, vector<2x5x16xf32>
    %39 = arith.addf %27, %38 : vector<2x5x16xf32>
    %c0_16 = arith.constant 0 : index
    %c16 = arith.constant 16 : index
    %40 = vector.load %arg4[%c0_16, %c16] : memref<5x32xf32, #tpu.memory_space<vmem>>, vector<1x16xf32>
    %41 = vector.shape_cast %40 : vector<1x16xf32> to vector<1x1x16xf32>
    %cst_17 = arith.constant 0.000000e+00 : f32
    %42 = vector.shape_cast %30 : vector<2x5x1xi1> to vector<2x5x1xi1>
    %43 = vector.broadcast %42 : vector<2x5x1xi1> to vector<2x5x16xi1>
    %44 = vector.shape_cast %41 : vector<1x1x16xf32> to vector<1x1x16xf32>
    %45 = vector.broadcast %44 : vector<1x1x16xf32> to vector<2x5x16xf32>
    %46 = vector.broadcast %cst_17 : f32 to vector<2x5x16xf32>
    %47 = arith.select %43, %45, %46 : vector<2x5x16xi1>, vector<2x5x16xf32>
    %48 = arith.addf %28, %47 : vector<2x5x16xf32>
    %c1_i32 = arith.constant 1 : i32
    %49 = vector.broadcast %c1_i32 : i32 to vector<2x5x1xi32>
    %50 = arith.cmpi eq, %24, %49 : vector<2x5x1xi32>
    %c1_18 = arith.constant 1 : index
    %c0_19 = arith.constant 0 : index
    %51 = vector.load %arg4[%c1_18, %c0_19] : memref<5x32xf32, #tpu.memory_space<vmem>>, vector<1x16xf32>
    %52 = vector.shape_cast %51 : vector<1x16xf32> to vector<1x1x16xf32>
    %cst_20 = arith.constant 0.000000e+00 : f32
    %53 = vector.shape_cast %50 : vector<2x5x1xi1> to vector<2x5x1xi1>
    %54 = vector.broadcast %53 : vector<2x5x1xi1> to vector<2x5x16xi1>
    %55 = vector.shape_cast %52 : vector<1x1x16xf32> to vector<1x1x16xf32>
    %56 = vector.broadcast %55 : vector<1x1x16xf32> to vector<2x5x16xf32>
    %57 = vector.broadcast %cst_20 : f32 to vector<2x5x16xf32>
    %58 = arith.select %54, %56, %57 : vector<2x5x16xi1>, vector<2x5x16xf32>
    %59 = arith.addf %39, %58 : vector<2x5x16xf32>
    %c1_21 = arith.constant 1 : index
    %c16_22 = arith.constant 16 : index
    %60 = vector.load %arg4[%c1_21, %c16_22] : memref<5x32xf32, #tpu.memory_space<vmem>>, vector<1x16xf32>
    %61 = vector.shape_cast %60 : vector<1x16xf32> to vector<1x1x16xf32>
    %cst_23 = arith.constant 0.000000e+00 : f32
    %62 = vector.shape_cast %50 : vector<2x5x1xi1> to vector<2x5x1xi1>
    %63 = vector.broadcast %62 : vector<2x5x1xi1> to vector<2x5x16xi1>
    %64 = vector.shape_cast %61 : vector<1x1x16xf32> to vector<1x1x16xf32>
    %65 = vector.broadcast %64 : vector<1x1x16xf32> to vector<2x5x16xf32>
    %66 = vector.broadcast %cst_23 : f32 to vector<2x5x16xf32>
    %67 = arith.select %63, %65, %66 : vector<2x5x16xi1>, vector<2x5x16xf32>
    %68 = arith.addf %48, %67 : vector<2x5x16xf32>
    %c2_i32 = arith.constant 2 : i32
    %69 = vector.broadcast %c2_i32 : i32 to vector<2x5x1xi32>
    %70 = arith.cmpi eq, %24, %69 : vector<2x5x1xi32>
    %c2 = arith.constant 2 : index
    %c0_24 = arith.constant 0 : index
    %71 = vector.load %arg4[%c2, %c0_24] : memref<5x32xf32, #tpu.memory_space<vmem>>, vector<1x16xf32>
    %72 = vector.shape_cast %71 : vector<1x16xf32> to vector<1x1x16xf32>
    %cst_25 = arith.constant 0.000000e+00 : f32
    %73 = vector.shape_cast %70 : vector<2x5x1xi1> to vector<2x5x1xi1>
    %74 = vector.broadcast %73 : vector<2x5x1xi1> to vector<2x5x16xi1>
    %75 = vector.shape_cast %72 : vector<1x1x16xf32> to vector<1x1x16xf32>
    %76 = vector.broadcast %75 : vector<1x1x16xf32> to vector<2x5x16xf32>
    %77 = vector.broadcast %cst_25 : f32 to vector<2x5x16xf32>
    %78 = arith.select %74, %76, %77 : vector<2x5x16xi1>, vector<2x5x16xf32>
    %79 = arith.addf %59, %78 : vector<2x5x16xf32>
    %c2_26 = arith.constant 2 : index
    %c16_27 = arith.constant 16 : index
    %80 = vector.load %arg4[%c2_26, %c16_27] : memref<5x32xf32, #tpu.memory_space<vmem>>, vector<1x16xf32>
    %81 = vector.shape_cast %80 : vector<1x16xf32> to vector<1x1x16xf32>
    %cst_28 = arith.constant 0.000000e+00 : f32
    %82 = vector.shape_cast %70 : vector<2x5x1xi1> to vector<2x5x1xi1>
    %83 = vector.broadcast %82 : vector<2x5x1xi1> to vector<2x5x16xi1>
    %84 = vector.shape_cast %81 : vector<1x1x16xf32> to vector<1x1x16xf32>
    %85 = vector.broadcast %84 : vector<1x1x16xf32> to vector<2x5x16xf32>
    %86 = vector.broadcast %cst_28 : f32 to vector<2x5x16xf32>
    %87 = arith.select %83, %85, %86 : vector<2x5x16xi1>, vector<2x5x16xf32>
    %88 = arith.addf %68, %87 : vector<2x5x16xf32>
    %c3_i32 = arith.constant 3 : i32
    %89 = vector.broadcast %c3_i32 : i32 to vector<2x5x1xi32>
    %90 = arith.cmpi eq, %24, %89 : vector<2x5x1xi32>
    %c3 = arith.constant 3 : index
    %c0_29 = arith.constant 0 : index
    %91 = vector.load %arg4[%c3, %c0_29] : memref<5x32xf32, #tpu.memory_space<vmem>>, vector<1x16xf32>
    %92 = vector.shape_cast %91 : vector<1x16xf32> to vector<1x1x16xf32>
    %cst_30 = arith.constant 0.000000e+00 : f32
    %93 = vector.shape_cast %90 : vector<2x5x1xi1> to vector<2x5x1xi1>
    %94 = vector.broadcast %93 : vector<2x5x1xi1> to vector<2x5x16xi1>
    %95 = vector.shape_cast %92 : vector<1x1x16xf32> to vector<1x1x16xf32>
    %96 = vector.broadcast %95 : vector<1x1x16xf32> to vector<2x5x16xf32>
    %97 = vector.broadcast %cst_30 : f32 to vector<2x5x16xf32>
    %98 = arith.select %94, %96, %97 : vector<2x5x16xi1>, vector<2x5x16xf32>
    %99 = arith.addf %79, %98 : vector<2x5x16xf32>
    %c3_31 = arith.constant 3 : index
    %c16_32 = arith.constant 16 : index
    %100 = vector.load %arg4[%c3_31, %c16_32] : memref<5x32xf32, #tpu.memory_space<vmem>>, vector<1x16xf32>
    %101 = vector.shape_cast %100 : vector<1x16xf32> to vector<1x1x16xf32>
    %cst_33 = arith.constant 0.000000e+00 : f32
    %102 = vector.shape_cast %90 : vector<2x5x1xi1> to vector<2x5x1xi1>
    %103 = vector.broadcast %102 : vector<2x5x1xi1> to vector<2x5x16xi1>
    %104 = vector.shape_cast %101 : vector<1x1x16xf32> to vector<1x1x16xf32>
    %105 = vector.broadcast %104 : vector<1x1x16xf32> to vector<2x5x16xf32>
    %106 = vector.broadcast %cst_33 : f32 to vector<2x5x16xf32>
    %107 = arith.select %103, %105, %106 : vector<2x5x16xi1>, vector<2x5x16xf32>
    %108 = arith.addf %88, %107 : vector<2x5x16xf32>
    %c4_i32_34 = arith.constant 4 : i32
    %109 = vector.broadcast %c4_i32_34 : i32 to vector<2x5x1xi32>
    %110 = arith.cmpi eq, %24, %109 : vector<2x5x1xi32>
    %c4 = arith.constant 4 : index
    %c0_35 = arith.constant 0 : index
    %111 = vector.load %arg4[%c4, %c0_35] : memref<5x32xf32, #tpu.memory_space<vmem>>, vector<1x16xf32>
    %112 = vector.shape_cast %111 : vector<1x16xf32> to vector<1x1x16xf32>
    %cst_36 = arith.constant 0.000000e+00 : f32
    %113 = vector.shape_cast %110 : vector<2x5x1xi1> to vector<2x5x1xi1>
    %114 = vector.broadcast %113 : vector<2x5x1xi1> to vector<2x5x16xi1>
    %115 = vector.shape_cast %112 : vector<1x1x16xf32> to vector<1x1x16xf32>
    %116 = vector.broadcast %115 : vector<1x1x16xf32> to vector<2x5x16xf32>
    %117 = vector.broadcast %cst_36 : f32 to vector<2x5x16xf32>
    %118 = arith.select %114, %116, %117 : vector<2x5x16xi1>, vector<2x5x16xf32>
    %119 = arith.addf %99, %118 : vector<2x5x16xf32>
    %c4_37 = arith.constant 4 : index
    %c16_38 = arith.constant 16 : index
    %120 = vector.load %arg4[%c4_37, %c16_38] : memref<5x32xf32, #tpu.memory_space<vmem>>, vector<1x16xf32>
    %121 = vector.shape_cast %120 : vector<1x16xf32> to vector<1x1x16xf32>
    %cst_39 = arith.constant 0.000000e+00 : f32
    %122 = vector.shape_cast %110 : vector<2x5x1xi1> to vector<2x5x1xi1>
    %123 = vector.broadcast %122 : vector<2x5x1xi1> to vector<2x5x16xi1>
    %124 = vector.shape_cast %121 : vector<1x1x16xf32> to vector<1x1x16xf32>
    %125 = vector.broadcast %124 : vector<1x1x16xf32> to vector<2x5x16xf32>
    %126 = vector.broadcast %cst_39 : f32 to vector<2x5x16xf32>
    %127 = arith.select %123, %125, %126 : vector<2x5x16xi1>, vector<2x5x16xf32>
    %128 = arith.addf %108, %127 : vector<2x5x16xf32>
    %129 = math.sin %22 : vector<2x5x16xf32>
    %cst_40 = arith.constant 0.000000e+00 : f32
    %130 = vector.shape_cast %26 : vector<2x5x1xi1> to vector<2x5x1xi1>
    %131 = vector.broadcast %130 : vector<2x5x1xi1> to vector<2x5x16xi1>
    %132 = vector.broadcast %cst_40 : f32 to vector<2x5x16xf32>
    %133 = arith.select %131, %129, %132 : vector<2x5x16xi1>, vector<2x5x16xf32>
    %134 = arith.addf %133, %119 : vector<2x5x16xf32>
    %c0_41 = arith.constant 0 : index
    %c0_42 = arith.constant 0 : index
    %c0_43 = arith.constant 0 : index
    %135 = vector.load %arg5[%c0_41, %c0_42, %c0_43] : memref<2x5x32xf32, #tpu.memory_space<vmem>>, vector<2x5x16xf32>
    tpu.vector_store %arg5[%c0_41, %c0_42, %c0_43], %134 {strides = array<i32>} : memref<2x5x32xf32, #tpu.memory_space<vmem>>, vector<2x5x16xf32>,
    %136 = math.cos %22 : vector<2x5x16xf32>
    %cst_44 = arith.constant 0.000000e+00 : f32
    %137 = vector.shape_cast %26 : vector<2x5x1xi1> to vector<2x5x1xi1>
    %138 = vector.broadcast %137 : vector<2x5x1xi1> to vector<2x5x16xi1>
    %139 = vector.broadcast %cst_44 : f32 to vector<2x5x16xf32>
    %140 = arith.select %138, %136, %139 : vector<2x5x16xi1>, vector<2x5x16xf32>
    %141 = arith.addf %140, %128 : vector<2x5x16xf32>
    %c0_45 = arith.constant 0 : index
    %c0_46 = arith.constant 0 : index
    %c16_47 = arith.constant 16 : index
    %142 = vector.load %arg5[%c0_45, %c0_46, %c16_47] : memref<2x5x32xf32, #tpu.memory_space<vmem>>, vector<2x5x16xf32>
    tpu.vector_store %arg5[%c0_45, %c0_46, %c16_47], %141 {strides = array<i32>} : memref<2x5x32xf32, #tpu.memory_space<vmem>>, vector<2x5x16xf32>,
    return
  }
}

</mosaic_0001>

<bundles_post_ra>
// kernel: tpu_custom_call.1
= control target key start
LH: loop header
LB: loop body
LE: loop exit
PB: predicated region body
PF: predicated region fallthrough
CT: control target
= control target key end

     0   :  { %10 = vsyncpa [#allocation3], 0  ;;  %s701_s18 = smov [#allocation2]   ;;  %s919_s0 = inlined_call_operand.hbm [shape: f32[2,5], index: 0, kind: input, shape index: {}]   ;;  %s920_s1 = inlined_call_operand.vmem [shape: f32[2,5], index: 1, kind: input, shape index: {}]   ;;  %s921_s2 = inlined_call_operand.vmem [shape: s32[2,5], index: 2, kind: input, shape index: {}]   ;;  %s922_s3 = inlined_call_operand.vmem [shape: f32[2,16], index: 3, kind: input, shape index: {}]   ;;  %s923_s4 = inlined_call_operand.vmem [shape: f32[5,32], index: 4, kind: input, shape index: {}]   ;;  %s924_s5 = inlined_call_operand.vmem [shape: f32[2,5,32], index: 5, kind: output, shape index: {}]  }
   0x1   :  { %s17_s19 = sshll.u32 %s701_s18, 4  ;;  %s677_s22 = scalar_lea.hbm %s919_s0, 32  ;;  %s18_s19 = int_to_ptr.vmem [resolvable:$true] %s17_s19 }
   0x2   :  { %p678_p0 = scmp.ne.s32.totalorder %s919_s0, %s677_s22  ;;  %p681_p1 = scmp.lt.u32.totalorder %s677_s22, %s919_s0 }
   0x4   :  { %p683_p2 = pnand %p681_p1, %p678_p0 }
   0x6   :  { %686 = shalt.err (!%p683_p2)
}
   0x7   :  { %s687_s27 = scalar_lea.vmem %s18_s19, 32  ;;  %p692_p4 = scmp.lt.s32.totalorder %s18_s19, %s18_s19 }
   0x8   :  { %p688_p3 = scmp.ne.s32.totalorder %s18_s19, %s687_s27  ;;  %p693_p5 = scmp.lt.s32.totalorder %s687_s27, %s687_s27 }
   0xa   :  { %p694_p6 = por %p693_p5, %p692_p4 }
   0xc   :  { %p695_p7 = pnand %p694_p6, %p688_p3 }
   0xe   :  { %698 = shalt.err (!%p695_p7)
}
   0xf   :  { %20 = dma.hbm_to_vmem [thread:$0]  %s919_s0, 32, %s18_s19, [#allocation3]  }
  0x10   :  { %699 = dma.done.wait [#allocation3], 32  }
  0x11   :  { %700 = vsyncadd [#allocation3], 4294967264  ;;  %v40_v0 = vlaneseq  ;;  %v35_v2 = vld [vmem:[%s920_s1] sm:$0x3]  ;;  %v32_v3 = vld [vmem:[#allocation2] sm:$0x3] }
  0x12   :  { %v36_v4 = vmul.f32 12.56637, %v35_v2  ;;  %v33_v6 = vmul.f32 12.56637, %v32_v3  ;;  %v82_v14 = vld [vmem:[%s921_s2] sm:$0x3] }
  0x13   :  { %v41_v1 = vshrl.u32 %v40_v0, 7  ;;  %v630_v17 = vld [vmem:[%s922_s3 + $0x1] ss:$0 sm:$0xff]  ;;  %v629_v18 = vld [vmem:[%s922_s3] ss:$0 sm:$0xff]  ;;  %s709_s23 = smov 16  }
  0x14   :  { %v628_v7 = vadd.f32 -6.283185, %v36_v4  ;;  %v627_v8 = vadd.f32 -6.283185, %v33_v6  ;;  %v631_v31 = vld [vmem:[%s923_s4] ss:$0 sm:$0xff] }
  0x15   :  { %v42_v5 = vsub.s32 0, %v41_v1  ;;  %v49_v9 = vsub.s32 1, %v41_v1  ;;  %v632_v32 = vld [vmem:[%s923_s4 + $0x1] ss:$0 sm:$0xff]  ;;  %v633_v37 = vld [vmem:[%s923_s4 + $0x2] ss:$0 sm:$0xff] }
  0x16   :  { %v634_v43 = vld [vmem:[%s923_s4 + $0x3] ss:$0 sm:$0xff]  ;;  %v635_v50 = vld [vmem:[%s923_s4 + $0x4] ss:$0 sm:$0xff]  ;;  %v702_v62 = vmov 1326507024  }
  0x17   :  { %v63_v10 = vrot.slane %v628_v7, %v42_v5  ;;  %v43_v11 = vrot.slane %v627_v8, %v42_v5  ;;  %v70_v12 = vrot.slane %v628_v7, %v49_v9  ;;  %v50_v13 = vrot.slane %v627_v8, %v49_v9  ;;  %s703_s4 = smov 112  }
  0x18   :  { %v93_v15 = vrot.slane %v82_v14, %v49_v9  ;;  %v86_v16 = vrot.slane %v82_v14, %v42_v5  ;;  %v704_v6 = vmov 920167782  }
  0x19   :  { %65 = vbcast.lane.b32.xlu1 %v63_v10, 256  ;;  %45 = vbcast.lane.b32.xlu0 %v43_v11, 256  ;;  %v705_v10 = vmov 2102212464  }
  0x1d   :  { %72 = vbcast.lane.b32.xlu1 %v70_v12, 256  ;;  %52 = vbcast.lane.b32.xlu0 %v50_v13, 256 }
  0x21   :  { %95 = vbcast.lane.b32.xlu1 %v93_v15, 256  ;;  %88 = vbcast.lane.b32.xlu0 %v86_v16, 256 }
  0x8b   :  { %v66_v19 = vpop.permute.xlu1 %65  ;;  %v46_v20 = vpop.permute.xlu0 %45 }
  0x8c   :  { %v78_v21 = vmul.f32 %v630_v17, %v66_v19  ;;  %v58_v22 = vmul.f32 %v629_v18, %v46_v20 }
  0x8e   :  { %v764_v23 = vadd.f32 %v78_v21, %v58_v22  ;;  %v706_v22 = vmov 683565275  }
  0x8f   :  { %v73_v24 = vpop.permute.xlu1 %72  ;;  %v53_v25 = vpop.permute.xlu0 %52 }
  0x90   :  { %v177_v26 = vand.u32 2139095040, %v764_v23  ;;  %v79_v27 = vmul.f32 %v630_v17, %v73_v24  ;;  %v59_v28 = vmul.f32 %v629_v18, %v53_v25  ;;  %v174_v59 = vand.u32 2147483647, %v764_v23 }
  0x91   :  { %v707_v25 = vmov 2475754826  }
  0x92   :  { %v178_v29 = vshrl.u32 %v177_v26, 23  ;;  %v767_v30 = vadd.f32 %v79_v27, %v59_v28  ;;  %v819_v9 = vand.u32 8388607, %v174_v59  ;;  %v708_v28 = vmov 2131351028  }
  0x93   :  { %v775_v33 = vpop.permute.xlu1 %95  ;;  %v777_v34 = vpop.permute.xlu0 %88 }
  0x94   :  { %v636_v35 = vadd.s32 4294967169, %v178_v29  ;;  %v281_v36 = vand.u32 2139095040, %v767_v30  ;;  %vm100_vm0 = vcmp.eq.s32.totalorder %v775_v33, 0  ;;  %vm115_vm1 = vcmp.eq.s32.totalorder %v775_v33, 1 }
  0x95   :  { %vm99_vm2 = vcmp.eq.s32.totalorder %v777_v34, 0  ;;  %vm114_vm3 = vcmp.eq.s32.totalorder %v777_v34, 1  ;;  %v111_v38 = vsel %vm100_vm0, %v631_v31, 0.0  ;;  %v126_v39 = vsel %vm115_vm1, %v632_v32, 0.0 }
  0x96   :  { %v184_v40 = vadd.s32 1, %v636_v35  ;;  %v282_v41 = vshrl.u32 %v281_v36, 23  ;;  %v128_v42 = vadd.f32 %v126_v39, %v111_v38  ;;  %vm130_vm4 = vcmp.eq.s32.totalorder %v775_v33, 2 }
  0x97   :  { %v141_v44 = vsel %vm130_vm4, %v633_v37, 0.0  ;;  %vm145_vm5 = vcmp.eq.s32.totalorder %v775_v33, 3  ;;  %vm160_vm6 = vcmp.eq.s32.totalorder %v775_v33, 4  ;;  %v110_v47 = vsel %vm99_vm2, %v631_v31, 0.0 }
  0x98   :  { %vm185_vm7 = vcmp.gt.s32.totalorder %v184_v40, 0  ;;  %v640_v45 = vadd.s32 4294967169, %v282_v41  ;;  %v143_v46 = vadd.f32 %v141_v44, %v128_v42  ;;  %v156_v49 = vsel %vm145_vm5, %v634_v43, 0.0 }
  0x99   :  { %v186_v48 = vsel %vm185_vm7, %v184_v40, 0  ;;  %v125_v51 = vsel %vm114_vm3, %v632_v32, 0.0  ;;  %vm129_vm8 = vcmp.eq.s32.totalorder %v777_v34, 2  ;;  %vm144_vm9 = vcmp.eq.s32.totalorder %v777_v34, 3 }
  0x9a   :  { %v799_v52 = vand.u32 31, %v186_v48  ;;  %v288_v53 = vadd.s32 1, %v640_v45  ;;  %v158_v54 = vadd.f32 %v156_v49, %v143_v46  ;;  %v127_v55 = vadd.f32 %v125_v51, %v110_v47 }
  0x9b   :  { %v171_v57 = vsel %vm160_vm6, %v635_v50, 0.0  ;;  %v140_v58 = vsel %vm129_vm8, %v633_v37, 0.0  ;;  %v155_v1 = vsel %vm144_vm9, %v634_v43, 0.0  ;;  %vm159_vm11 = vcmp.eq.s32.totalorder %v777_v34, 4 }
  0x9c   :  { %v803_v56 = vsub.s32 32, %v799_v52  ;;  %vm289_vm10 = vcmp.gt.s32.totalorder %v288_v53, 0  ;;  %v808_v60 = vadd.f32 %v171_v57, %v158_v54  ;;  %v142_v61 = vadd.f32 %v140_v58, %v127_v55 }
  0x9d   :  { %v290_v0 = vsel %vm289_vm10, %v288_v53, 0  ;;  %v813_v5 = vshrl.u32 %v186_v48, 5  ;;  %v203_v7 = vshll.u32 %v704_v6, %v799_v52  ;;  %v278_v8 = vand.u32 2147483647, %v767_v30 }
  0x9e   :  { %v204_v63 = vshrl.u32 %v702_v62, %v803_v56  ;;  %v291_v2 = vshrl.u32 %v290_v0, 5  ;;  %v292_v3 = vand.u32 31, %v290_v0  ;;  %605 = vrot.lane.b32.xlu1 %v808_v60, %s703_s4  ;;  %v157_v4 = vadd.f32 %v155_v1, %v142_v61 }
  0x9f   :  { %v200_v11 = vshll.u32 %v705_v10, %v799_v52  ;;  %v201_v12 = vshrl.u32 %v704_v6, %v803_v56  ;;  %v170_v14 = vsel %vm159_vm11, %v635_v50, 0.0  ;;  %v285_v21 = vand.u32 8388607, %v278_v8 }
  0xa0   :  { %v293_v13 = vsub.s32 32, %v292_v3  ;;  %v205_v15 = vor.u32 %v204_v63, %v203_v7  ;;  %v304_v16 = vshll.u32 %v705_v10, %v292_v3  ;;  %v307_v17 = vshll.u32 %v704_v6, %v292_v3 }
  0xa1   :  { %v823_v18 = vadd.f32 %v170_v14, %v157_v4  ;;  %vm313_vm12 = vcmp.lt.s32.totalorder %v291_v2, 4  ;;  %v295_v24 = vshll.u32 %v706_v22, %v292_v3  ;;  %v298_v27 = vshll.u32 %v707_v25, %v292_v3 }
  0xa2   :  { %v305_v19 = vshrl.u32 %v704_v6, %v293_v13  ;;  %v308_v20 = vshrl.u32 %v702_v62, %v293_v13  ;;  %v296_v26 = vshrl.u32 %v707_v25, %v293_v13  ;;  %v299_v29 = vshrl.u32 %v708_v28, %v293_v13 }
  0xa3   :  { %603 = vrot.lane.b32.xlu0 %v823_v18, %s703_s4  ;;  %v286_v35 = vor.u32 8388608, %v285_v21  ;;  %v294_v36 = vshrl.u32 %v706_v22, %v293_v13  ;;  %v301_v39 = vshll.u32 %v708_v28, %v292_v3  ;;  %v302_v40 = vshrl.u32 %v705_v10, %v293_v13 }
  0xa4   :  { %v306_v31 = vor.u32 %v305_v19, %v304_v16  ;;  %v309_v32 = vor.u32 %v308_v20, %v307_v17  ;;  %v297_v37 = vor.u32 %v296_v26, %v295_v24  ;;  %v300_v38 = vor.u32 %v299_v29, %v298_v27 }
  0xa5   :  { %vm310_vm13 = vcmp.lt.s32.totalorder %v291_v2, 1  ;;  %vm312_vm14 = vcmp.lt.s32.totalorder %v291_v2, 3  ;;  %vm209_vm15 = vcmp.lt.s32.totalorder %v813_v5, 4  ;;  %v303_v43 = vor.u32 %v302_v40, %v301_v39 }
  0xa6   :  { %v319_v41 = vsel %vm313_vm12, %v306_v31, 920167782  ;;  %v323_v42 = vsel %vm313_vm12, %v309_v32, 1326507024  ;;  %v318_v44 = vsel %vm310_vm13, %v297_v37, %v300_v38  ;;  %v202_v46 = vor.u32 %v201_v12, %v200_v11 }
  0xa7   :  { %v324_v45 = vsel %vm312_vm14, %v306_v31, %v323_v42  ;;  %v219_v47 = vsel %vm209_vm15, %v205_v15, 1326507024  ;;  %vm311_vm0 = vcmp.lt.s32.totalorder %v291_v2, 2  ;;  %v314_v48 = vsel %vm310_vm13, %v294_v36, %v297_v37 }
  0xa8   :  { %v315_v49 = vsel %vm313_vm12, %v303_v43, 2102212464  ;;  %v320_v50 = vsel %vm312_vm14, %v303_v43, %v319_v41  ;;  %v322_v51 = vsel %vm310_vm13, %v300_v38, %v303_v43  ;;  %v326_v53 = vshll.u32 %v286_v35, 8 }
  0xa9   :  { %v316_v54 = vsel %vm312_vm14, %v300_v38, %v315_v49  ;;  %v321_v55 = vsel %vm311_vm0, %v318_v44, %v320_v50  ;;  %v325_v57 = vsel %vm311_vm0, %v322_v51, %v324_v45  ;;  %v192_v58 = vshrl.u32 %v707_v25, %v803_v56 }
  0xaa   :  { %v317_v61 = vsel %vm311_vm0, %v314_v48, %v316_v54  ;;  %v835_v62 = vmul.u32.u64.low %v326_v53, %v325_v57  ;;  %v836_v63 = vmul.u32.u64.high %v326_v53, %v325_v57, %v835_v62  ;;  %v191_v0 = vshll.u32 %v706_v22, %v799_v52 }
  0xab   :  { %v839_v1 = vmul.u32.u64.low %v326_v53, %v321_v55  ;;  %v840_v3 = vmul.u32.u64.high %v326_v53, %v321_v55, %v839_v1  ;;  %v182_v2 = vor.u32 8388608, %v819_v9  ;;  %v194_v4 = vshll.u32 %v707_v25, %v799_v52 }
  0xac   :  { %v193_v6 = vor.u32 %v192_v58, %v191_v0  ;;  %v195_v7 = vshrl.u32 %v708_v28, %v803_v56  ;;  %v197_v11 = vshll.u32 %v708_v28, %v799_v52  ;;  %v198_v12 = vshrl.u32 %v705_v10, %v803_v56 }
  0xad   :  { %v215_v13 = vsel %vm209_vm15, %v202_v46, 920167782  ;;  %v333_v14 = vmul.u32 %v326_v53, %v317_v61  ;;  %v190_v15 = vshrl.u32 %v706_v22, %v803_v56  ;;  %vm206_vm1 = vcmp.lt.s32.totalorder %v813_v5, 1 }
  0xae   :  { %vm335_vm2 = vc.u32 %v836_v63, %v839_v1  ;;  %v196_v9 = vor.u32 %v195_v7, %v194_v4  ;;  %v199_v16 = vor.u32 %v198_v12, %v197_v11  ;;  %vm208_vm3 = vcmp.lt.s32.totalorder %v813_v5, 3 }
  0xaf   :  { %v336_v17 = vadd.s32 1, %v840_v3  ;;  %vm207_vm4 = vcmp.lt.s32.totalorder %v813_v5, 2  ;;  %v220_v52 = vsel %vm208_vm3, %v202_v46, %v219_v47  ;;  %v222_v10 = vshll.u32 %v182_v2, 8 }
  0xb0   :  { %v211_v19 = vsel %vm209_vm15, %v199_v16, 2102212464  ;;  %v214_v20 = vsel %vm206_vm1, %v193_v6, %v196_v9  ;;  %v216_v21 = vsel %vm208_vm3, %v199_v16, %v215_v13  ;;  %v218_v56 = vsel %vm206_vm1, %v196_v9, %v199_v16 }
  0xb1   :  { %v337_v22 = vsel %vm335_vm2, %v336_v17, %v840_v3  ;;  %v210_v24 = vsel %vm206_vm1, %v190_v15, %v193_v6  ;;  %v217_v25 = vsel %vm207_vm4, %v214_v20, %v216_v21  ;;  %v221_v26 = vsel %vm207_vm4, %v218_v56, %v220_v52 }
  0xb2   :  { %v338_v27 = vadd.s32 %v337_v22, %v333_v14  ;;  %v212_v28 = vsel %vm208_vm3, %v196_v9, %v211_v19  ;;  %v862_v29 = vmul.u32.u64.low %v222_v10, %v221_v26  ;;  %v863_v31 = vmul.u32.u64.high %v222_v10, %v221_v26, %v862_v29 }
  0xb3   :  { %v865_v32 = vmul.u32.u64.low %v222_v10, %v217_v25  ;;  %v866_v35 = vmul.u32.u64.high %v222_v10, %v217_v25, %v865_v32  ;;  %v213_v37 = vsel %vm207_vm4, %v210_v24, %v212_v28  ;;  %v334_v55 = vadd.s32 %v839_v1, %v836_v63 }
  0xb4   :  { %v339_v36 = vadd.s32 536870912, %v338_v27  ;;  %v229_v41 = vmul.u32 %v222_v10, %v213_v37  ;;  %vm280_vm8 = vcmp.lt.s32.totalorder %v767_v30, 0  ;;  %vm279_vm9 = vcmp.le.f32.partialorder %v278_v8, 0.7853982 }
  0xb5   :  { %vm231_vm5 = vc.u32 %v863_v31, %v865_v32  ;;  %v232_v39 = vadd.s32 1, %v866_v35  ;;  %v230_v15 = vadd.s32 %v865_v32, %v863_v31  ;;  %vm176_vm10 = vcmp.lt.s32.totalorder %v764_v23, 0 }
  0xb6   :  { %v340_v38 = vshrl.u32 %v339_v36, 30  ;;  %vm175_vm11 = vcmp.le.f32.partialorder %v174_v59, 0.7853982  ;;  %vm370_vm15 = vweird.f32 %v767_v30  ;;  %vm98_vm0 = vcmp.ne.s32.totalorder %v775_v33, 4 }
  0xb7   :  { %v233_v42 = vsel %vm231_vm5, %v232_v39, %v866_v35  ;;  %vm390_vm1 = vcmask 126976   ;;  %vm266_vm5 = vweird.f32 %v764_v23 }
  0xb8   :  { %v341_v40 = vshll.u32 %v340_v38, 30  ;;  %v234_v44 = vadd.s32 %v233_v42, %v229_v41  ;;  %v364_v1 = vsub.s32 4, %v340_v38 }
  0xba   :  { %v342_v43 = vsub.s32 %v338_v27, %v341_v40  ;;  %v235_v46 = vadd.s32 536870912, %v234_v44  ;;  %v365_v22 = vsel %vm280_vm8, %v364_v1, %v340_v38 }
  0xbb   :  { %v367_v26 = vsel %vm279_vm9, 0, %v365_v22 }
  0xbc   :  { %v344_v45 = vsub.s32 0, %v342_v43  ;;  %v236_v48 = vshrl.u32 %v235_v46, 30  ;;  %v371_v32 = vadd.s32 3, %v367_v26 }
  0xbe   :  { %v641_v47 = vmin.u32 %v344_v45, %v342_v43  ;;  %v237_v50 = vshll.u32 %v236_v48, 30  ;;  %v260_v31 = vsub.s32 4, %v236_v48  ;;  %v372_v37 = vand.u32 3, %v371_v32 }
  0xc0   :  { %v346_v49 = vclz %v641_v47  ;;  %v238_v5 = vsub.s32 %v234_v44, %v237_v50  ;;  %v261_v36 = vsel %vm176_vm10, %v260_v31, %v236_v48  ;;  %vm377_vm12 = vcmp.eq.s32.totalorder %v372_v37, 2 }
  0xc1   :  { %v263_v40 = vsel %vm175_vm11, 0, %v261_v36  ;;  %vm374_vm13 = vcmp.eq.s32.totalorder %v372_v37, 0  ;;  %vm373_vm14 = vcmp.lt.s32.totalorder %v372_v37, 2 }
  0xc2   :  { %v642_v51 = vadd.s32 4294967294, %v346_v49  ;;  %v240_v54 = vsub.s32 0, %v238_v5  ;;  %v267_v45 = vadd.s32 3, %v263_v40 }
  0xc4   :  { %vm643_vm6 = vcmp.lt.s32.totalorder %v642_v51, 0  ;;  %v637_v61 = vmin.u32 %v240_v54, %v238_v5  ;;  %v268_v49 = vand.u32 3, %v267_v45 }
  0xc5   :  { %v349_v53 = vsel %vm643_vm6, 0, %v642_v51  ;;  %vm97_vm6 = vcmp.ne.s32.totalorder %v777_v34, 4 }
  0xc6   :  { %v350_v57 = vsub.s32 32, %v349_v53  ;;  %v354_v58 = vsub.s32 4294967266, %v349_v53  ;;  %v351_v62 = vshll.u32 %v342_v43, %v349_v53  ;;  %v242_v2 = vclz %v637_v61 }
  0xc7   :  { %vm273_vm2 = vcmp.eq.s32.totalorder %v268_v49, 2  ;;  %vm270_vm3 = vcmp.eq.s32.totalorder %v268_v49, 0  ;;  %vm269_vm4 = vcmp.lt.s32.totalorder %v268_v49, 2 }
  0xc8   :  { %v352_v0 = vshrl.u32 %v334_v55, %v350_v57  ;;  %v355_v3 = vadd.s32 127, %v354_v58  ;;  %v638_v7 = vadd.s32 4294967294, %v242_v2 }
  0xca   :  { %v353_v4 = vor.u32 %v352_v0, %v351_v62  ;;  %v356_v6 = vshll.u32 %v355_v3, 23  ;;  %vm639_vm7 = vcmp.lt.s32.totalorder %v638_v7, 0  ;;  %v589_v0 = vand.u32 3, %v367_v26 }
  0xcb   :  { %v245_v14 = vsel %vm639_vm7, 0, %v638_v7 }
  0xcc   :  { %v357_v11 = vor.u32 4788187, %v356_v6  ;;  %v360_v13 = vcvt.s32.f32 %v353_v4  ;;  %v246_v9 = vsub.s32 32, %v245_v14  ;;  %v250_v16 = vsub.s32 4294967266, %v245_v14 }
  0xcd   :  { %v247_v17 = vshll.u32 %v238_v5, %v245_v14  ;;  %vm591_vm7 = vcmp.eq.s32.totalorder %v589_v0, 0  ;;  %v486_v4 = vand.u32 3, %v263_v40 }
  0xce   :  { %v358_v12 = vand.u32 2147483647, %v357_v11  ;;  %v248_v52 = vshrl.u32 %v230_v15, %v246_v9  ;;  %v251_v10 = vadd.s32 127, %v250_v16 }
  0xd0   :  { %v361_v63 = vmul.f32 %v360_v13, %v358_v12  ;;  %v249_v20 = vor.u32 %v248_v52, %v247_v17  ;;  %v252_v21 = vshll.u32 %v251_v10, 23 }
  0xd2   :  { %v362_v19 = vxor.u32 2147483648, %v361_v63  ;;  %v253_v25 = vor.u32 4788187, %v252_v21  ;;  %v256_v28 = vcvt.s32.f32 %v249_v20 }
  0xd4   :  { %v363_v56 = vsel %vm280_vm8, %v362_v19, %v361_v63  ;;  %v254_v27 = vand.u32 2147483647, %v253_v25  ;;  %vm594_vm8 = vcmp.eq.s32.totalorder %v589_v0, 2 }
  0xd5   :  { %v366_v24 = vsel %vm279_vm9, %v767_v30, %v363_v56  ;;  %vm590_vm9 = vcmp.lt.s32.totalorder %v589_v0, 2 }
  0xd6   :  { %669 = vcosq.f32 %v366_v24  ;;  %v257_v29 = vmul.f32 %v256_v28, %v254_v27 }
  0xd7   :  { %671 = vsinq.f32 %v366_v24 }
  0xd8   :  { %v258_v35 = vxor.u32 2147483648, %v257_v29 }
  0xda   :  { %v259_v8 = vsel %vm176_vm10, %v258_v35, %v257_v29  ;;  %vm488_vm10 = vcmp.eq.s32.totalorder %v486_v4, 0 }
  0xdb   :  { %v262_v38 = vsel %vm175_vm11, %v764_v23, %v259_v8  ;;  %vm491_vm11 = vcmp.eq.s32.totalorder %v486_v4, 2 }
  0xdc   :  { %673 = vcosq.f32 %v262_v38 }
  0xdd   :  { %675 = vsinq.f32 %v262_v38 }
  0xe0   :  { %v670_v39 = vpop.eup %669 }
  0xe1   :  { %v672_v41 = vpop.eup %671  ;;  %v378_v42 = vxor.u32 2147483648, %v670_v39 }
  0xe2   :  { %v375_v43 = vxor.u32 2147483648, %v672_v41 }
  0xe3   :  { %v379_v44 = vsel %vm377_vm12, %v378_v42, %v672_v41  ;;  %v596_v2 = vsel %vm594_vm8, %v378_v42, %v672_v41  ;;  %vm487_vm12 = vcmp.lt.s32.totalorder %v486_v4, 2 }
  0xe4   :  { %v376_v46 = vsel %vm374_vm13, %v670_v39, %v375_v43  ;;  %v593_v3 = vsel %vm591_vm7, %v670_v39, %v375_v43  ;;  %vm619_vm13 = vcmask 258176  }
  0xe5   :  { %v380_v59 = vsel %vm373_vm14, %v376_v46, %v379_v44  ;;  %v597_v6 = vsel %vm590_vm9, %v593_v3, %v596_v2 }
  0xe6   :  { %v381_v47 = vsel %vm370_vm15, nan, %v380_v59  ;;  %v674_v51 = vpop.eup %673 }
  0xe7   :  { %v387_v48 = vsel %vm98_vm0, %v381_v47, 0.0  ;;  %v676_v5 = vpop.eup %675  ;;  %v274_v53 = vxor.u32 2147483648, %v674_v51 }
  0xe8   :  { %v389_v50 = vadd.f32 %v387_v48, %v808_v60  ;;  %v271_v54 = vxor.u32 2147483648, %v676_v5 }
  0xe9   :  { %v275_v55 = vsel %vm273_vm2, %v274_v53, %v676_v5  ;;  %v493_v11 = vsel %vm491_vm11, %v274_v53, %v676_v5 }
  0xea   :  { %392 = vst.msk [vmem:[%s924_s5 + $0x8] sm:$0x1f] %vm390_vm1, %v389_v50  ;;  %v272_v57 = vsel %vm270_vm3, %v674_v51, %v271_v54  ;;  %v490_v7 = vsel %vm488_vm10, %v674_v51, %v271_v54 }
  0xeb   :  { %v276_v58 = vsel %vm269_vm4, %v272_v57, %v275_v55  ;;  %v494_v12 = vsel %vm487_vm12, %v490_v7, %v493_v11 }
  0xec   :  { %v277_v60 = vsel %vm266_vm5, nan, %v276_v58  ;;  %v495_v9 = vsel %vm266_vm5, nan, %v494_v12 }
  0xed   :  { %v386_v61 = vsel %vm97_vm6, %v277_v60, 0.0  ;;  %v599_v63 = vsel %vm97_vm6, %v495_v9, 0.0 }
  0xee   :  { %v388_v62 = vadd.f32 %v386_v61, %v823_v18  ;;  %v598_v18 = vsel %vm370_vm15, nan, %v597_v6 }
  0xef   :  { %v600_v14 = vsel %vm98_vm0, %v598_v18, 0.0 }
  0xf0   :  { %391 = vst.msk [vmem:[%s924_s5] sm:$0x1f] %vm390_vm1, %v388_v62 }
 0x110   :  { %v606_v13 = vpop.permute.xlu1 %605 }
 0x111   :  { %v610_v15 = vadd.f32 %v606_v13, %v600_v14 }
 0x113   :  { %615 = vrot.lane.b32.xlu1 %v610_v15, %s709_s23 }
 0x115   :  { %v604_v16 = vpop.permute.xlu0 %603 }
 0x116   :  { %v609_v1 = vadd.f32 %v604_v16, %v599_v63 }
 0x118   :  { %613 = vrot.lane.b32.xlu0 %v609_v1, %s709_s23 }
 0x185   :  { %v616_v30 = vpop.permute.xlu1 %615 }
 0x186   :  { %621 = vst.msk [vmem:[%s924_s5 + $0x8] sm:$0x1f] %vm619_vm13, %v616_v30 }
 0x18a   :  { %v614_v33 = vpop.permute.xlu0 %613 }
 0x18b   :  { %620 = vst.msk [vmem:[%s924_s5] sm:$0x1f] %vm619_vm13, %v614_v33 }
 0x18c   :  { %626 = vsyncpa [#allocation3], 1 }

</bundles_post_ra>
